<compile_context>
chip_gen: v7x
topology: tpu7x:2x2x1
jax: 0.10.0
libtpu: 0.0.40
codegen_flags: <defaults>
</compile_context>

<pallas_src>
import functools

import jax
import jax.numpy as jnp
from jax.experimental import pallas as pl
from jax.experimental.pallas import tpu as pltpu


def mlp_kernel(p_ref, x_ref, o_ref, *, in_size, h1, out_size):
    """One lane-dense batch tile.

    p_ref : SMEM f32[n_params]   -- flat [w1 | b1 | w2 | b2], nn.Linear row-major layout.
    x_ref : VMEM f32[in_size, TB] -- batch on the lane axis.
    o_ref : VMEM f32[out_size, TB].
    """
    x = x_ref[...]                       # [in_size, TB]
    tb = x.shape[1]

    w1_off = 0
    b1_off = w1_off + h1 * in_size
    w2_off = b1_off + h1
    b2_off = w2_off + out_size * h1

    # Layer 1: h[j,:] = sigmoid(b1[j] + sum_k W1[j,k] * x[k,:])
    # Pure VPU FMAs (scalar splat * lane vector); sigmoid -> EUP.  No MXU.
    h_rows = []
    for j in range(h1):
        acc = jnp.full((1, tb), p_ref[b1_off + j], dtype=jnp.float32)
        for k in range(in_size):
            acc = acc + p_ref[w1_off + j * in_size + k] * x[k:k + 1, :]
        h_rows.append(jax.nn.sigmoid(acc))

    # Layer 2: o[m,:] = sigmoid(b2[m] + sum_j W2[m,j] * h[j,:])
    for m in range(out_size):
        acc = jnp.full((1, tb), p_ref[b2_off + m], dtype=jnp.float32)
        for j in range(h1):
            acc = acc + p_ref[w2_off + m * h1 + j] * h_rows[j]
        # Lane-dense (TB is a multiple of 128) -> unmasked vector store.
        o_ref[m:m + 1, :] = jax.nn.sigmoid(acc)


def pack_params(w1, b1, w2, b2):
    """Flatten nn.Linear params into one contiguous f32 vector.

    Done ONCE at parameter init/load time; reused across all forward calls."""
    return jnp.concatenate([
        w1.reshape(-1), b1.reshape(-1), w2.reshape(-1), b2.reshape(-1)
    ]).astype(jnp.float32)


def mlp_forward(x, params_flat, *, in_size, h1, out_size, block_b=2048):
    """x: [B, in_size] -> sigmoid(L2(sigmoid(L1(x)))) : [B, out_size] (f32)."""
    B = x.shape[0]
    lane = 128
    # Batch-lane tile: multiple of 128, capped at block_b, never larger than needed.
    tb = max(lane, min(block_b, pl.cdiv(B, lane) * lane))
    b_pad = pl.cdiv(B, tb) * tb

    # Lane-dense layout: batch -> lane axis (wrapper-side layout plumbing only).
    xt = jnp.zeros((in_size, b_pad), jnp.float32).at[:, :B].set(
        x.astype(jnp.float32).T)

    kernel = functools.partial(
        mlp_kernel, in_size=in_size, h1=h1, out_size=out_size)

    out_t = pl.pallas_call(
        kernel,
        out_shape=jax.ShapeDtypeStruct((out_size, b_pad), jnp.float32),
        grid=(b_pad // tb,),
        in_specs=[
            # Tiny flat param vector: resident in SMEM, fetched once, scalar reads.
            pl.BlockSpec(memory_space=pltpu.MemorySpace.SMEM),
            # x stream: pipelined lane-dense batch tiles.
            pl.BlockSpec((in_size, tb), lambda i: (0, i)),
        ],
        out_specs=pl.BlockSpec((out_size, tb), lambda i: (0, i)),
        compiler_params=pltpu.CompilerParams(
            # v7x: shard batch tiles across both TensorCores; no-op on v5e/v6e.
            dimension_semantics=("parallel",),
        ),
    )(params_flat, xt)

    return out_t[:, :B].T


def mlp_predict(x, params_flat, *, in_size, h1, out_size, block_b=2048):
    return mlp_forward(x, params_flat, in_size=in_size, h1=h1,
                       out_size=out_size, block_b=block_b) >= 0.5


def init_linear_params(key, in_features, out_features):
    """Deterministic init mimicking nn.Linear: U(-1/sqrt(in), 1/sqrt(in))."""
    kw, kb = jax.random.split(key)
    bound = 1.0 / jnp.sqrt(jnp.float32(in_features))
    w = jax.random.uniform(kw, (out_features, in_features), jnp.float32,
                           minval=-bound, maxval=bound)
    b = jax.random.uniform(kb, (out_features,), jnp.float32,
                           minval=-bound, maxval=bound)
    return w, b


if __name__ == "__main__":
    # XOR problem scale: input_size=2, H1=4, output_size=1.
    input_size, H1, output_size = 2, 4, 1

    key = jax.random.PRNGKey(0)
    k_x, k_l1, k_l2, k_xl = jax.random.split(key, 4)

    w1, b1 = init_linear_params(k_l1, input_size, H1)
    w2, b2 = init_linear_params(k_l2, H1, output_size)
    # Pack once at init time; reused across every forward call.
    params = jax.block_until_ready(pack_params(w1, b1, w2, b2))

    def ref_fwd(xv):
        return jax.nn.sigmoid(jax.nn.sigmoid(xv @ w1.T + b1) @ w2.T + b2)

    # Small (XOR-scale) batch.  NOTE: at B=8 this op is 100% dispatch-bound; in
    # real use, fold into the surrounding jit graph or batch thousands of rows.
    x_small = jax.random.uniform(k_x, (8, input_size), jnp.float32)
    out_small = jax.block_until_ready(
        mlp_forward(x_small, params, in_size=input_size, h1=H1,
                    out_size=output_size))
    assert out_small.shape == (8, output_size)
    assert jnp.allclose(out_small, ref_fwd(x_small), atol=1e-5, rtol=1e-5)

    # Larger batch exercising the 1-D batch grid + padding path (grid of 4 tiles).
    x_large = jax.random.uniform(k_xl, (1000, input_size), jnp.float32)
    out_large = jax.block_until_ready(
        mlp_forward(x_large, params, in_size=input_size, h1=H1,
                    out_size=output_size, block_b=256))
    assert out_large.shape == (1000, output_size)
    assert jnp.allclose(out_large, ref_fwd(x_large), atol=1e-5, rtol=1e-5)

    # predict() path.
    pred = jax.block_until_ready(
        mlp_predict(x_small, params, in_size=input_size, h1=H1,
                    out_size=output_size))
    assert jnp.array_equal(pred, ref_fwd(x_small) >= 0.5)

    print("KERNEL_OK")
</pallas_src>

<mosaic_0001>
module attributes {stable_mosaic.version = 11 : i64} {
  func.func @mlp_kernel(%arg0: i32, %arg1: memref<17xf32, #tpu.memory_space<smem>>, %arg2: memref<2x128xf32, #tpu.memory_space<vmem>>, %arg3: memref<1x128xf32, #tpu.memory_space<vmem>>) attributes {dimension_semantics = [#tpu.dimension_semantics<parallel>], iteration_bounds = array<i64: 1>, scalar_prefetch = 0 : i64, scratch_operands = 0 : i64, tpu.core_type = #tpu.core_type<tc>, window_params = [{transform_indices = @transform_0, window_bounds = array<i64: 17>}, {transform_indices = @transform_1, window_bounds = array<i64: 2, 128>}, {transform_indices = @transform_2, window_bounds = array<i64: 1, 128>}]} {
    %c0 = arith.constant 0 : index
    %c0_0 = arith.constant 0 : index
    %0 = vector.load %arg2[%c0, %c0_0] : memref<2x128xf32, #tpu.memory_space<vmem>>, vector<2x128xf32>
    %c8 = arith.constant 8 : index
    %1 = memref.load %arg1[%c8] : memref<17xf32, #tpu.memory_space<smem>>
    %2 = vector.broadcast %1 : f32 to vector<1x128xf32>
    %c0_1 = arith.constant 0 : index
    %3 = memref.load %arg1[%c0_1] : memref<17xf32, #tpu.memory_space<smem>>
    %4 = vector.extract_strided_slice %0 {offsets = [0, 0], sizes = [1, 128], strides = [1, 1]} : vector<2x128xf32> to vector<1x128xf32>
    %5 = vector.broadcast %3 : f32 to vector<1x128xf32>
    %6 = arith.mulf %5, %4 : vector<1x128xf32>
    %7 = arith.addf %2, %6 : vector<1x128xf32>
    %c1 = arith.constant 1 : index
    %8 = memref.load %arg1[%c1] : memref<17xf32, #tpu.memory_space<smem>>
    %9 = vector.extract_strided_slice %0 {offsets = [1, 0], sizes = [1, 128], strides = [1, 1]} : vector<2x128xf32> to vector<1x128xf32>
    %10 = vector.broadcast %8 : f32 to vector<1x128xf32>
    %11 = arith.mulf %10, %9 : vector<1x128xf32>
    %12 = arith.addf %7, %11 : vector<1x128xf32>
    %13 = arith.negf %12 : vector<1x128xf32>
    %14 = math.exp %13 : vector<1x128xf32>
    %cst = arith.constant 1.000000e+00 : f32
    %15 = vector.broadcast %cst : f32 to vector<1x128xf32>
    %16 = arith.addf %15, %14 : vector<1x128xf32>
    %17 = arith.divf %15, %16 : vector<1x128xf32>
    %c9 = arith.constant 9 : index
    %18 = memref.load %arg1[%c9] : memref<17xf32, #tpu.memory_space<smem>>
    %19 = vector.broadcast %18 : f32 to vector<1x128xf32>
    %c2 = arith.constant 2 : index
    %20 = memref.load %arg1[%c2] : memref<17xf32, #tpu.memory_space<smem>>
    %21 = vector.extract_strided_slice %0 {offsets = [0, 0], sizes = [1, 128], strides = [1, 1]} : vector<2x128xf32> to vector<1x128xf32>
    %22 = vector.broadcast %20 : f32 to vector<1x128xf32>
    %23 = arith.mulf %22, %21 : vector<1x128xf32>
    %24 = arith.addf %19, %23 : vector<1x128xf32>
    %c3 = arith.constant 3 : index
    %25 = memref.load %arg1[%c3] : memref<17xf32, #tpu.memory_space<smem>>
    %26 = vector.extract_strided_slice %0 {offsets = [1, 0], sizes = [1, 128], strides = [1, 1]} : vector<2x128xf32> to vector<1x128xf32>
    %27 = vector.broadcast %25 : f32 to vector<1x128xf32>
    %28 = arith.mulf %27, %26 : vector<1x128xf32>
    %29 = arith.addf %24, %28 : vector<1x128xf32>
    %30 = arith.negf %29 : vector<1x128xf32>
    %31 = math.exp %30 : vector<1x128xf32>
    %cst_2 = arith.constant 1.000000e+00 : f32
    %32 = vector.broadcast %cst_2 : f32 to vector<1x128xf32>
    %33 = arith.addf %32, %31 : vector<1x128xf32>
    %34 = arith.divf %32, %33 : vector<1x128xf32>
    %c10 = arith.constant 10 : index
    %35 = memref.load %arg1[%c10] : memref<17xf32, #tpu.memory_space<smem>>
    %36 = vector.broadcast %35 : f32 to vector<1x128xf32>
    %c4 = arith.constant 4 : index
    %37 = memref.load %arg1[%c4] : memref<17xf32, #tpu.memory_space<smem>>
    %38 = vector.extract_strided_slice %0 {offsets = [0, 0], sizes = [1, 128], strides = [1, 1]} : vector<2x128xf32> to vector<1x128xf32>
    %39 = vector.broadcast %37 : f32 to vector<1x128xf32>
    %40 = arith.mulf %39, %38 : vector<1x128xf32>
    %41 = arith.addf %36, %40 : vector<1x128xf32>
    %c5 = arith.constant 5 : index
    %42 = memref.load %arg1[%c5] : memref<17xf32, #tpu.memory_space<smem>>
    %43 = vector.extract_strided_slice %0 {offsets = [1, 0], sizes = [1, 128], strides = [1, 1]} : vector<2x128xf32> to vector<1x128xf32>
    %44 = vector.broadcast %42 : f32 to vector<1x128xf32>
    %45 = arith.mulf %44, %43 : vector<1x128xf32>
    %46 = arith.addf %41, %45 : vector<1x128xf32>
    %47 = arith.negf %46 : vector<1x128xf32>
    %48 = math.exp %47 : vector<1x128xf32>
    %cst_3 = arith.constant 1.000000e+00 : f32
    %49 = vector.broadcast %cst_3 : f32 to vector<1x128xf32>
    %50 = arith.addf %49, %48 : vector<1x128xf32>
    %51 = arith.divf %49, %50 : vector<1x128xf32>
    %c11 = arith.constant 11 : index
    %52 = memref.load %arg1[%c11] : memref<17xf32, #tpu.memory_space<smem>>
    %53 = vector.broadcast %52 : f32 to vector<1x128xf32>
    %c6 = arith.constant 6 : index
    %54 = memref.load %arg1[%c6] : memref<17xf32, #tpu.memory_space<smem>>
    %55 = vector.extract_strided_slice %0 {offsets = [0, 0], sizes = [1, 128], strides = [1, 1]} : vector<2x128xf32> to vector<1x128xf32>
    %56 = vector.broadcast %54 : f32 to vector<1x128xf32>
    %57 = arith.mulf %56, %55 : vector<1x128xf32>
    %58 = arith.addf %53, %57 : vector<1x128xf32>
    %c7 = arith.constant 7 : index
    %59 = memref.load %arg1[%c7] : memref<17xf32, #tpu.memory_space<smem>>
    %60 = vector.extract_strided_slice %0 {offsets = [1, 0], sizes = [1, 128], strides = [1, 1]} : vector<2x128xf32> to vector<1x128xf32>
    %61 = vector.broadcast %59 : f32 to vector<1x128xf32>
    %62 = arith.mulf %61, %60 : vector<1x128xf32>
    %63 = arith.addf %58, %62 : vector<1x128xf32>
    %64 = arith.negf %63 : vector<1x128xf32>
    %65 = math.exp %64 : vector<1x128xf32>
    %cst_4 = arith.constant 1.000000e+00 : f32
    %66 = vector.broadcast %cst_4 : f32 to vector<1x128xf32>
    %67 = arith.addf %66, %65 : vector<1x128xf32>
    %68 = arith.divf %66, %67 : vector<1x128xf32>
    %c16 = arith.constant 16 : index
    %69 = memref.load %arg1[%c16] : memref<17xf32, #tpu.memory_space<smem>>
    %70 = vector.broadcast %69 : f32 to vector<1x128xf32>
    %c12 = arith.constant 12 : index
    %71 = memref.load %arg1[%c12] : memref<17xf32, #tpu.memory_space<smem>>
    %72 = vector.broadcast %71 : f32 to vector<1x128xf32>
    %73 = arith.mulf %72, %17 : vector<1x128xf32>
    %74 = arith.addf %70, %73 : vector<1x128xf32>
    %c13 = arith.constant 13 : index
    %75 = memref.load %arg1[%c13] : memref<17xf32, #tpu.memory_space<smem>>
    %76 = vector.broadcast %75 : f32 to vector<1x128xf32>
    %77 = arith.mulf %76, %34 : vector<1x128xf32>
    %78 = arith.addf %74, %77 : vector<1x128xf32>
    %c14 = arith.constant 14 : index
    %79 = memref.load %arg1[%c14] : memref<17xf32, #tpu.memory_space<smem>>
    %80 = vector.broadcast %79 : f32 to vector<1x128xf32>
    %81 = arith.mulf %80, %51 : vector<1x128xf32>
    %82 = arith.addf %78, %81 : vector<1x128xf32>
    %c15 = arith.constant 15 : index
    %83 = memref.load %arg1[%c15] : memref<17xf32, #tpu.memory_space<smem>>
    %84 = vector.broadcast %83 : f32 to vector<1x128xf32>
    %85 = arith.mulf %84, %68 : vector<1x128xf32>
    %86 = arith.addf %82, %85 : vector<1x128xf32>
    %87 = arith.negf %86 : vector<1x128xf32>
    %88 = math.exp %87 : vector<1x128xf32>
    %cst_5 = arith.constant 1.000000e+00 : f32
    %89 = vector.broadcast %cst_5 : f32 to vector<1x128xf32>
    %90 = arith.addf %89, %88 : vector<1x128xf32>
    %91 = arith.divf %89, %90 : vector<1x128xf32>
    %c0_6 = arith.constant 0 : index
    %c0_7 = arith.constant 0 : index
    %92 = vector.load %arg3[%c0_6, %c0_7] : memref<1x128xf32, #tpu.memory_space<vmem>>, vector<1x128xf32>
    tpu.vector_store %arg3[%c0_6, %c0_7], %91 {strides = array<i32>} : memref<1x128xf32, #tpu.memory_space<vmem>>, vector<1x128xf32>,
    return
  }
  func.func @transform_0(%arg0: i32) -> i32 {
    %c0_i32 = arith.constant 0 : i32
    %c0_i32_0 = arith.constant 0 : i32
    return %c0_i32 : i32
  }
  func.func @transform_1(%arg0: i32) -> (i32, i32) {
    %c0_i32 = arith.constant 0 : i32
    %c0_i32_0 = arith.constant 0 : i32
    return %c0_i32, %arg0 : i32, i32
  }
  func.func @transform_2(%arg0: i32) -> (i32, i32) {
    %c0_i32 = arith.constant 0 : i32
    %c0_i32_0 = arith.constant 0 : i32
    return %c0_i32, %arg0 : i32, i32
  }
}

</mosaic_0001>

<bundles_post_ra>
// kernel: tpu_custom_call.1
= control target key start
LH: loop header
LB: loop body
LE: loop exit
PB: predicated region body
PF: predicated region fallthrough
CT: control target
= control target key end

     0   :  { %7 = vsyncpa [#allocation4], 0  ;;  %s269_s0 = inlined_call_operand.hbm [shape: f32[17], index: 0, kind: input, shape index: {}]   ;;  %s270_s1 = inlined_call_operand.vmem [shape: f32[2,128], index: 1, kind: input, shape index: {}]   ;;  %s271_s2 = inlined_call_operand.hbm [shape: f32[1,128], index: 2, kind: output, shape index: {}]  }
   0x1   :  { %8 = vsyncpa [#allocation3], 0  ;;  %s183_s11 = scalar_lea.hbm %s269_s0, 16 }
   0x2   :  { %p184_p0 = scmp.ne.s32.totalorder %s269_s0, %s183_s11  ;;  %p187_p1 = scmp.lt.u32.totalorder %s183_s11, %s269_s0 }
   0x4   :  { %p189_p2 = pnand %p187_p1, %p184_p0 }
   0x6   :  { %192 = shalt.err (!%p189_p2)
}
   0x7   :  { %s219_s16 = smov [#allocation2]  }
   0x8   :  { %16 = dma.hbm_to_smem %s269_s0, 16, %s219_s16, [#allocation4]  }
   0x9   :  { %215 = dma.done.wait [#allocation4], 16  }
   0xa   :  { %216 = vsyncadd [#allocation4], 4294967280 }
   0xb   :  { %22 = sfence }
   0xc   :  { %s140_s19 = sld [smem:[#allocation2 + $0x8]]  ;;  %s141_s21 = sld [smem:[#allocation2 + $0x1]]  ;;  %v23_v0 = vld [vmem:[%s270_s1] sm:$0x3] }
   0xd   :  { %s26_s20 = sld [smem:[#allocation2]]  ;;  %s143_s22 = sld [smem:[#allocation2 + $0x9]] }
   0xe   :  { %s144_s23 = sld [smem:[#allocation2 + $0x2]]  ;;  %s145_s24 = sld [smem:[#allocation2 + $0x3]] }
   0xf   :  { %s248_s25 = sld [smem:[#allocation2 + $0xa]]  ;;  %s148_s26 = sld [smem:[#allocation2 + $0x4]] }
  0x10   :  { %s149_s29 = sld [smem:[#allocation2 + $0x5]]  ;;  %s253_s30 = sld [smem:[#allocation2 + $0xb]] }
  0x11   :  { %s152_s0 = sld [smem:[#allocation2 + $0x6]]  ;;  %s153_s3 = sld [smem:[#allocation2 + $0x7]] }
  0x12   :  { %v25_v1 = vstv %s140_s19  ;;  %v31_v4 = vstv %s141_s21  ;;  %s156_s1 = sld [smem:[#allocation2 + $0xc]]  ;;  %s157_s4 = sld [smem:[#allocation2 + $0xd]] }
  0x13   :  { %v27_v2 = vstv %s26_s20  ;;  %v32_v5 = vmul.f32 %v31_v4, %v23_v0  ;;  %v44_v6 = vstv %s143_s22  ;;  %s155_s5 = sld [smem:[#allocation2 + $0x10]]  ;;  %s158_s6 = sld [smem:[#allocation2 + $0xe]] }
  0x14   :  { %v28_v3 = vmul.f32 %v27_v2, %v23_v0  ;;  %v46_v7 = vstv %s144_s23  ;;  %v50_v8 = vstv %s145_s24  ;;  %s159_s7 = sld [smem:[#allocation2 + $0xf]]  ;;  %s220_s8 = smov [#allocation5]  }
  0x15   :  { %v47_v10 = vmul.f32 %v46_v7, %v23_v0  ;;  %v51_v11 = vmul.f32 %v50_v8, %v23_v0  ;;  %v34_v12 = vrot.slane %v32_v5, 1  ;;  %v63_v13 = vstv %s248_s25  ;;  %s131_s9 = sshll.u32 %s220_s8, 4  ;;  %s132_s9 = int_to_ptr.vmem [resolvable:$true] %s131_s9 }
  0x16   :  { %v29_v9 = vadd.f32 %v28_v3, %v25_v1  ;;  %v65_v14 = vstv %s148_s26  ;;  %v69_v15 = vstv %s149_s29  ;;  %v82_v21 = vstv %s253_s30  ;;  %s193_s10 = scalar_lea.vmem %s132_s9, 16  ;;  %s197_s11 = scalar_lea.vmem %s132_s9, 32 }
  0x17   :  { %v48_v16 = vadd.f32 %v47_v10, %v44_v6  ;;  %v53_v17 = vrot.slane %v51_v11, 1  ;;  %v66_v18 = vmul.f32 %v65_v14, %v23_v0  ;;  %v70_v19 = vmul.f32 %v69_v15, %v23_v0  ;;  %p194_p3 = scmp.ne.s32.totalorder %s132_s9, %s193_s10  ;;  %p198_p4 = scmp.lt.s32.totalorder %s132_s9, %s132_s9 }
  0x18   :  { %v36_v20 = vadd.f32 %v34_v12, %v29_v9  ;;  %v84_v22 = vstv %s152_s0  ;;  %v88_v23 = vstv %s153_s3  ;;  %v103_v45 = vstv %s156_s1  ;;  %p199_p5 = scmp.lt.s32.totalorder %s197_s11, %s193_s10 }
  0x19   :  { %v55_v24 = vadd.f32 %v53_v17, %v48_v16  ;;  %v67_v25 = vadd.f32 %v66_v18, %v63_v13  ;;  %v72_v26 = vrot.slane %v70_v19, 1  ;;  %v85_v27 = vmul.f32 %v84_v22, %v23_v0 }
  0x1a   :  { %v142_v28 = vmul.f32 -1.442695, %v36_v20  ;;  %v89_v29 = vmul.f32 %v88_v23, %v23_v0  ;;  %v107_v46 = vstv %s157_s4  ;;  %v101_v48 = vstv %s155_s5  ;;  %p200_p6 = por %p199_p5, %p198_p4 }
  0x1b   :  { %v146_v30 = vmul.f32 -1.442695, %v55_v24  ;;  %v74_v31 = vadd.f32 %v72_v26, %v67_v25  ;;  %v86_v32 = vadd.f32 %v85_v27, %v82_v21  ;;  %v111_v51 = vstv %s158_s6 }
  0x1c   :  { %163 = vpow2.f32 %v142_v28  ;;  %v91_v33 = vrot.slane %v89_v29, 1  ;;  %v115_v56 = vstv %s159_s7  ;;  %p201_p7 = pnand %p200_p6, %p194_p3 }
  0x1d   :  { %165 = vpow2.f32 %v146_v30  ;;  %v150_v34 = vmul.f32 -1.442695, %v74_v31 }
  0x1e   :  { %v93_v35 = vadd.f32 %v91_v33, %v86_v32 }
  0x1f   :  { %167 = vpow2.f32 %v150_v34 }
  0x20   :  { %v154_v36 = vmul.f32 -1.442695, %v93_v35 }
  0x22   :  { %169 = vpow2.f32 %v154_v36 }
  0x26   :  { %v164_v37 = vpop.eup %163 }
  0x27   :  { %v166_v38 = vpop.eup %165  ;;  %v40_v39 = vadd.f32 1.0, %v164_v37 }
  0x28   :  { %v59_v40 = vadd.f32 1.0, %v166_v38 }
  0x29   :  { %v168_v41 = vpop.eup %167  ;;  %171 = vrcp.f32 %v40_v39 }
  0x2a   :  { %173 = vrcp.f32 %v59_v40  ;;  %v78_v42 = vadd.f32 1.0, %v168_v41 }
  0x2c   :  { %v170_v43 = vpop.eup %169  ;;  %175 = vrcp.f32 %v78_v42 }
  0x2d   :  { %v97_v44 = vadd.f32 1.0, %v170_v43 }
  0x2f   :  { %177 = vrcp.f32 %v97_v44 }
  0x33   :  { %v172_v47 = vpop.eup %171 }
  0x34   :  { %v174_v49 = vpop.eup %173  ;;  %v104_v50 = vmul.f32 %v172_v47, %v103_v45 }
  0x35   :  { %v108_v52 = vmul.f32 %v174_v49, %v107_v46 }
  0x36   :  { %v176_v53 = vpop.eup %175  ;;  %v105_v54 = vadd.f32 %v104_v50, %v101_v48 }
  0x37   :  { %v112_v55 = vmul.f32 %v176_v53, %v111_v51 }
  0x38   :  { %v109_v57 = vadd.f32 %v108_v52, %v105_v54 }
  0x39   :  { %v178_v58 = vpop.eup %177 }
  0x3a   :  { %v113_v59 = vadd.f32 %v112_v55, %v109_v57  ;;  %v116_v60 = vmul.f32 %v178_v58, %v115_v56 }
  0x3c   :  { %v117_v61 = vadd.f32 %v116_v60, %v113_v59 }
  0x3e   :  { %v160_v62 = vmul.f32 -1.442695, %v117_v61 }
  0x40   :  { %179 = vpow2.f32 %v160_v62 }
  0x4a   :  { %v180_v63 = vpop.eup %179 }
  0x4b   :  { %v121_v0 = vadd.f32 1.0, %v180_v63 }
  0x4d   :  { %181 = vrcp.f32 %v121_v0 }
  0x57   :  { %v182_v1 = vpop.eup %181 }
  0x58   :  { %124 = vst [vmem:[#allocation5] sm:$0x1] %v182_v1 }
  0x59   :  { %204 = shalt.err (!%p201_p7)
}
  0x5a   :  { %s205_s14 = scalar_lea.hbm %s271_s2, 16 }
  0x5b   :  { %p206_p8 = scmp.ne.s32.totalorder %s271_s2, %s205_s14  ;;  %p209_p9 = scmp.lt.u32.totalorder %s205_s14, %s271_s2 }
  0x5d   :  { %p211_p10 = pnand %p209_p9, %p206_p8 }
  0x5f   :  { %214 = shalt.err (!%p211_p10)
}
  0x60   :  { %134 = dma.vmem_to_hbm [thread:$0]  %s132_s9, 16, %s271_s2, [#allocation3]  }
  0x61   :  { %217 = dma.done.wait [#allocation3], 16  }
  0x62   :  { %218 = vsyncadd [#allocation3], 4294967280 }
  0x63   :  { %138 = vsyncpa [#allocation3], 1 }
  0x64   :  { %139 = vsyncpa [#allocation4], 1 }

</bundles_post_ra>
